<compile_context>
chip_gen: v5e
topology: v5e:2x2
jax: 0.10.0
libtpu: 0.0.40
codegen_flags: <defaults>
</compile_context>

<pallas_src>
import jax
import jax.numpy as jnp
from jax.experimental import pallas as pl
from jax.experimental.pallas import tpu as pltpu


def aspect_gate_kernel(x_ref, w_ref, b_ref, o_ref):
    # x_ref: (tbw, E)
    # w_ref: (E, 2*A*D)   -- [:, :A*D] = Wm (pre-transposed), [:, A*D:] = Wmg
    # b_ref: (1, 2*A*D)
    # o_ref: (tbw, A*D)
    ad = o_ref.shape[-1]
    y = jnp.dot(x_ref[...], w_ref[...], preferred_element_type=jnp.float32)
    y = y + b_ref[...]
    term_1 = y[:, :ad]
    gate = jax.nn.sigmoid(y[:, ad:])
    o_ref[...] = (term_1 * gate).astype(o_ref.dtype)


def aspect_gate_control(reviews_conv, Wm, bm, Wmg, bmg, *, tbw_max=512):
    """
    reviews_conv: (B, W, E) float32
    Wm, Wmg:      (A, D, E)
    bm, bmg:      (A, 1, D)
    returns:      (B, A, W, D)   -- matches PyTorch AspectGateControl.forward
    """
    B, W, E = reviews_conv.shape
    A, D, _ = Wm.shape
    AD = A * D
    BW = B * W

    # --- hoist all weight layout work out of the kernel (done once) ---------
    # w_m[e, a*D + d] = Wm[a, d, e]  (pre-transposed so the MXU is fed directly)
    w_m = jnp.transpose(Wm, (2, 0, 1)).reshape(E, AD)
    w_mg = jnp.transpose(Wmg, (2, 0, 1)).reshape(E, AD)
    w_all = jnp.concatenate([w_m, w_mg], axis=1)                 # (E, 2*A*D)
    b_all = jnp.concatenate(
        [bm.reshape(1, AD), bmg.reshape(1, AD)], axis=1)          # (1, 2*A*D)

    x_flat = reviews_conv.reshape(BW, E).astype(jnp.float32)

    # --- BW tiling: biggest tile that keeps VMEM happy; weights stay resident
    if BW <= tbw_max:
        tbw = BW                      # full dim -> (8,128) rule satisfied
    else:
        tbw = tbw_max                 # multiple of 8; remainder block handled
    grid_bw = pl.cdiv(BW, tbw)

    out_flat = pl.pallas_call(
        aspect_gate_kernel,
        out_shape=jax.ShapeDtypeStruct((BW, AD), jnp.float32),
        grid_spec=pltpu.PrefetchScalarGridSpec(
            num_scalar_prefetch=0,
            grid=(grid_bw,),
            in_specs=[
                # x: tiled along BW, double-buffered by the pipeline
                pl.BlockSpec((tbw, E), lambda i: (i, 0)),
                # fused weights / biases: constant index -> resident in VMEM
                pl.BlockSpec((E, 2 * AD), lambda i: (0, 0)),
                pl.BlockSpec((1, 2 * AD), lambda i: (0, 0)),
            ],
            out_specs=pl.BlockSpec((tbw, AD), lambda i: (i, 0)),
        ),
        compiler_params=pltpu.CompilerParams(
            # BW tiles are independent -> megacore-parallel on v7x, no-op on
            # single-TC chips.
            dimension_semantics=("parallel",),
            # Above the 16/32 MiB scoped defaults, below v7x's 64 MiB physical.
            vmem_limit_bytes=48 * 1024 * 1024,
        ),
    )(x_flat, w_all, b_all)

    # (BW, A*D) -> (B, W, A, D) -> (B, A, W, D)
    return out_flat.reshape(B, W, A, D).transpose(0, 2, 1, 3)


def reference(reviews_conv, Wm, bm, Wmg, bmg):
    t1 = jnp.einsum('ade,bwe->bawd', Wm, reviews_conv) + bm
    t2 = jax.nn.sigmoid(jnp.einsum('ade,bwe->bawd', Wmg, reviews_conv) + bmg)
    return t1 * t2


if __name__ == "__main__":
    # Small shapes consistent with the module's forward semantics.
    batch_size = 2
    num_words = 8
    embedding_dim = 32
    embedding_aspect = 16
    num_aspects = 4

    key = jax.random.PRNGKey(0)
    kx, kwm, kbm, kwmg, kbmg = jax.random.split(key, 5)

    reviews_conv = jax.random.normal(
        kx, (batch_size, num_words, embedding_dim), dtype=jnp.float32)
    Wm = jax.random.normal(
        kwm, (num_aspects, embedding_aspect, embedding_dim), dtype=jnp.float32)
    bm = jax.random.normal(
        kbm, (num_aspects, 1, embedding_aspect), dtype=jnp.float32)
    Wmg = jax.random.normal(
        kwmg, (num_aspects, embedding_aspect, embedding_dim), dtype=jnp.float32)
    bmg = jax.random.normal(
        kbmg, (num_aspects, 1, embedding_aspect), dtype=jnp.float32)

    out = aspect_gate_control(reviews_conv, Wm, bm, Wmg, bmg)
    out = jax.block_until_ready(out)

    ref = reference(reviews_conv, Wm, bm, Wmg, bmg)
    assert out.shape == (batch_size, num_aspects, num_words, embedding_aspect)
    assert jnp.allclose(out, ref, atol=1e-4, rtol=1e-4), "mismatch vs reference"

    print("KERNEL_OK")
</pallas_src>

<mosaic_0001>
module attributes {stable_mosaic.version = 11 : i64} {
  func.func @aspect_gate_kernel(%arg0: i32, %arg1: memref<16x32xf32, #tpu.memory_space<vmem>>, %arg2: memref<32x128xf32, #tpu.memory_space<vmem>>, %arg3: memref<1x128xf32, #tpu.memory_space<vmem>>, %arg4: memref<16x64xf32, #tpu.memory_space<vmem>>) attributes {dimension_semantics = [#tpu.dimension_semantics<parallel>], iteration_bounds = array<i64: 1>, scalar_prefetch = 0 : i64, scratch_operands = 0 : i64, tpu.core_type = #tpu.core_type<tc>, window_params = [{transform_indices = @transform_0, window_bounds = array<i64: 16, 32>}, {pipeline_mode = #tpu.pipeline_mode<synchronous>, transform_indices = @transform_1, window_bounds = array<i64: 32, 128>}, {pipeline_mode = #tpu.pipeline_mode<synchronous>, transform_indices = @transform_2, window_bounds = array<i64: 1, 128>}, {transform_indices = @transform_3, window_bounds = array<i64: 16, 64>}]} {
    %c0 = arith.constant 0 : index
    %c0_0 = arith.constant 0 : index
    %0 = vector.load %arg1[%c0, %c0_0] : memref<16x32xf32, #tpu.memory_space<vmem>>, vector<16x32xf32>
    %c0_1 = arith.constant 0 : index
    %c0_2 = arith.constant 0 : index
    %1 = vector.load %arg2[%c0_1, %c0_2] : memref<32x128xf32, #tpu.memory_space<vmem>>, vector<32x128xf32>
    %cst = arith.constant dense<0.000000e+00> : vector<16x128xf32>
    %2 = tpu.matmul %0, %1, %cst {dimension_numbers = #tpu.dot_dimension_numbers<[1], [0], [0], [1], [0, 0, 1, 1], [], []>} : vector<16x32xf32>, vector<32x128xf32>, vector<16x128xf32> -> vector<16x128xf32>
    %c0_3 = arith.constant 0 : index
    %c0_4 = arith.constant 0 : index
    %3 = vector.load %arg3[%c0_3, %c0_4] : memref<1x128xf32, #tpu.memory_space<vmem>>, vector<1x128xf32>
    %4 = vector.broadcast %3 : vector<1x128xf32> to vector<16x128xf32>
    %5 = arith.addf %2, %4 : vector<16x128xf32>
    %6 = vector.extract_strided_slice %5 {offsets = [0, 0], sizes = [16, 64], strides = [1, 1]} : vector<16x128xf32> to vector<16x64xf32>
    %7 = vector.extract_strided_slice %5 {offsets = [0, 64], sizes = [16, 64], strides = [1, 1]} : vector<16x128xf32> to vector<16x64xf32>
    %8 = arith.negf %7 : vector<16x64xf32>
    %9 = math.exp %8 : vector<16x64xf32>
    %cst_5 = arith.constant 1.000000e+00 : f32
    %10 = vector.broadcast %cst_5 : f32 to vector<16x64xf32>
    %11 = arith.addf %10, %9 : vector<16x64xf32>
    %12 = arith.divf %10, %11 : vector<16x64xf32>
    %13 = arith.mulf %6, %12 : vector<16x64xf32>
    %c0_6 = arith.constant 0 : index
    %c0_7 = arith.constant 0 : index
    %14 = vector.load %arg4[%c0_6, %c0_7] : memref<16x64xf32, #tpu.memory_space<vmem>>, vector<16x64xf32>
    tpu.vector_store %arg4[%c0_6, %c0_7], %13 {strides = array<i32>} : memref<16x64xf32, #tpu.memory_space<vmem>>, vector<16x64xf32>,
    return
  }
  func.func @transform_0(%arg0: i32) -> (i32, i32) {
    %c0_i32 = arith.constant 0 : i32
    %c0_i32_0 = arith.constant 0 : i32
    return %arg0, %c0_i32 : i32, i32
  }
  func.func @transform_1(%arg0: i32) -> (i32, i32) {
    %c0_i32 = arith.constant 0 : i32
    %c0_i32_0 = arith.constant 0 : i32
    %c0_i32_1 = arith.constant 0 : i32
    return %c0_i32, %c0_i32_0 : i32, i32
  }
  func.func @transform_2(%arg0: i32) -> (i32, i32) {
    %c0_i32 = arith.constant 0 : i32
    %c0_i32_0 = arith.constant 0 : i32
    %c0_i32_1 = arith.constant 0 : i32
    return %c0_i32, %c0_i32_0 : i32, i32
  }
  func.func @transform_3(%arg0: i32) -> (i32, i32) {
    %c0_i32 = arith.constant 0 : i32
    %c0_i32_0 = arith.constant 0 : i32
    return %arg0, %c0_i32 : i32, i32
  }
}

</mosaic_0001>

<bundles_post_ra>
// kernel: tpu_custom_call.1
= control target key start
LH: loop header
LB: loop body
LE: loop exit
PB: predicated region body
PF: predicated region fallthrough
CT: control target
= control target key end

     0   :  { %8 = vsyncpa [#allocation3], 0  ;;  %s306_s0 = inlined_call_operand.hbm [shape: f32[16,32], index: 0, kind: input, shape index: {}]   ;;  %s307_s1 = inlined_call_operand.hbm [shape: f32[32,128], index: 1, kind: input, shape index: {}]   ;;  %s308_s2 = inlined_call_operand.vmem [shape: f32[1,128], index: 2, kind: input, shape index: {}]   ;;  %s309_s3 = inlined_call_operand.hbm [shape: f32[16,64], index: 3, kind: output, shape index: {}]  }
   0x1   :  { %9 = vsyncpa [#allocation6], 0 }
   0x2   :  { %10 = vsyncpa [#allocation4], 0  ;;  %s15_s14 = sshll.u32 %s306_s0, 4  ;;  %s259_s15 = smov [#allocation2]   ;;  %s16_s14 = int_to_ptr.hbm [resolvable:$true] %s15_s14 }
   0x3   :  { %s17_s16 = sshll.u32 %s259_s15, 4  ;;  %s28_s19 = sshll.u32 %s307_s1, 4  ;;  %s18_s16 = int_to_ptr.vmem [resolvable:$true] %s17_s16  ;;  %s29_s19 = int_to_ptr.hbm [resolvable:$true] %s28_s19 }
   0x4   :  { %s260_s20 = smov 128   ;;  %s261_s21 = smov 8  }
   0x5   :  { %23 = dma.hbm_to_vmem [thread:$0]  %s16_s14, 256, %s18_s16, [#allocation3], %s260_s20, %s260_s20, %s261_s21  }
   0x6   :  { %s262_s22 = smov [#allocation5]  }
   0x7   :  { %s30_s23 = sshll.u32 %s262_s22, 4  ;;  %s31_s23 = int_to_ptr.vmem [resolvable:$true] %s30_s23 }
   0x8   :  { %36 = dma.hbm_to_vmem [thread:$0]  %s29_s19, 512, %s31_s23, [#allocation6], %s260_s20, %s260_s20, %s261_s21  }
   0x9   :  { %253 = dma.done.wait [#allocation3], 256  }
   0xa   :  { %254 = vsyncadd [#allocation3], 4294967040 }
   0xb   :  { %255 = dma.done.wait [#allocation6], 512  }
   0xc   :  { %256 = vsyncadd [#allocation6], 4294966784  ;;  %v52_v0 = vld [vmem:[#allocation5 + $0x18] sm:$0xff]  ;;  %v51_v1 = vld [vmem:[#allocation5 + $0x10] sm:$0xff]  ;;  %vm57_vm0 = vcmask 261120   ;;  %vm135_vm9 = vcmask 523264  }
   0xd   :  { %76 = vmatpush.msra.mxu0 %v52_v0  ;;  %162 = vmatpush.msra.mxu1 %v52_v0  ;;  %v50_v2 = vld [vmem:[#allocation5 + $0x8] sm:$0xff]  ;;  %v49_v3 = vld [vmem:[#allocation5] sm:$0xff]  ;;  %v47_v4 = vld [vmem:[#allocation2] sm:$0xff]  ;;  %s264_s24 = smov [#allocation7]   ;;  %s144_s28 = sshll.u32 %s309_s3, 4  ;;  %s145_s28 = int_to_ptr.hbm [resolvable:$true] %s144_s28 }
   0xe   :  { %v48_v5 = vld [vmem:[#allocation2 + $0x8] sm:$0xff]  ;;  %v172_v6 = vld [vmem:[%s308_s2] ss:$0 sm:$0xff]  ;;  %s263_s2 = smov 64   ;;  %s142_s25 = sshll.u32 %s264_s24, 4  ;;  %s143_s25 = int_to_ptr.vmem [resolvable:$true] %s142_s25 }
   0xf   :  { %77 = vmatpush.msra.mxu0 %v51_v1  ;;  %163 = vmatpush.msra.mxu1 %v51_v1 }
  0x11   :  { %78 = vmatpush.msra.mxu0 %v50_v2  ;;  %164 = vmatpush.msra.mxu1 %v50_v2 }
  0x13   :  { %79 = vmatpush.msra.mxu0 %v49_v3  ;;  %165 = vmatpush.msra.mxu1 %v49_v3 }
  0x14   :  { %158 = vmatmul.msk.f32.vlgmr.msra.gmra.mxu0 %vm57_vm0, %v47_v4  ;;  %159 = vmatmul.msk.f32.vlgmr.msra.gmra.mxu1 %vm57_vm0, %v48_v5 }
  0x91   :  { %v81_v7 = vpop.f32.mrf.mxu0  ;;  %v84_v8 = vpop.f32.mrf.mxu1 }
  0x92   :  { %v82_v9 = vadd.f32 %v172_v6, %v81_v7  ;;  %v85_v10 = vadd.f32 %v172_v6, %v84_v8 }
  0x94   :  { %v160_v11 = vmul.f32 -1.442695, %v82_v9  ;;  %v161_v12 = vmul.f32 -1.442695, %v85_v10 }
  0x96   :  { %173 = vpow2.f32 %v160_v11 }
  0x97   :  { %175 = vpow2.f32 %v161_v12 }
  0x9c   :  { %v174_v13 = vpop.eup %173 }
  0x9d   :  { %v176_v14 = vpop.eup %175  ;;  %v93_v15 = vadd.f32 1.0, %v174_v13 }
  0x9e   :  { %v94_v16 = vadd.f32 1.0, %v176_v14 }
  0x9f   :  { %177 = vrcp.f32 %v93_v15  ;;  %v106_v22 = vand.u32 2147483648, %v93_v15  ;;  %v104_v25 = vand.u32 2147483647, %v93_v15  ;;  %vm100_vm2 = vweird.f32 %v93_v15 }
  0xa0   :  { %179 = vrcp.f32 %v94_v16  ;;  %vm115_vm5 = vweird.f32 %v94_v16  ;;  %v121_v32 = vand.u32 2147483648, %v94_v16  ;;  %v119_v33 = vand.u32 2147483647, %v94_v16 }
  0xa1   :  { %v107_v28 = vor.u32 1.1754944e-38, %v106_v22  ;;  %vm105_vm4 = vcmp.eq.f32.partialorder %v104_v25, 8.507059e+37 }
  0xa2   :  { %v122_v35 = vor.u32 1.1754944e-38, %v121_v32  ;;  %vm120_vm8 = vcmp.eq.f32.partialorder %v119_v33, 8.507059e+37 }
  0xa5   :  { %v178_v17 = vpop.eup %177 }
  0xa6   :  { %v180_v18 = vpop.eup %179  ;;  %v96_v19 = vmul.f32 %v178_v17, %v93_v15  ;;  %vm101_vm1 = vweird.f32 %v178_v17 }
  0xa7   :  { %v111_v20 = vmul.f32 %v180_v18, %v94_v16  ;;  %vm102_vm3 = vmor %vm100_vm2, %vm101_vm1  ;;  %vm116_vm6 = vweird.f32 %v180_v18 }
  0xa8   :  { %v97_v21 = vsub.f32 1.0, %v96_v19  ;;  %vm117_vm7 = vmor %vm115_vm5, %vm116_vm6 }
  0xa9   :  { %v112_v23 = vsub.f32 1.0, %v111_v20 }
  0xaa   :  { %v98_v24 = vmul.f32 %v178_v17, %v97_v21 }
  0xab   :  { %v113_v27 = vmul.f32 %v180_v18, %v112_v23 }
  0xac   :  { %v99_v26 = vadd.f32 %v178_v17, %v98_v24 }
  0xad   :  { %v114_v31 = vadd.f32 %v180_v18, %v113_v27 }
  0xae   :  { %v103_v29 = vsel %vm102_vm3, %v178_v17, %v99_v26 }
  0xaf   :  { %v108_v30 = vsel %vm105_vm4, %v107_v28, %v103_v29  ;;  %v118_v34 = vsel %vm117_vm7, %v180_v18, %v114_v31 }
  0xb0   :  { %127 = vrot.lane.b32.xlu0 %v108_v30, %s263_s2  ;;  %v123_v36 = vsel %vm120_vm8, %v122_v35, %v118_v34 }
  0xb8   :  { %129 = vrot.lane.b32.xlu0 %v123_v36, %s263_s2 }
 0x122   :  { %v128_v37 = vpop.permute.xlu0 %127 }
 0x123   :  { %v133_v38 = vmul.f32 %v128_v37, %v82_v9 }
 0x125   :  { %136 = vst.msk [vmem:[#allocation7] sm:$0xff] %vm135_vm9, %v133_v38 }
 0x12a   :  { %v130_v39 = vpop.permute.xlu0 %129 }
 0x12b   :  { %v134_v40 = vmul.f32 %v130_v39, %v85_v10 }
 0x12d   :  { %137 = vst.msk [vmem:[#allocation7 + $0x8] sm:$0xff] %vm135_vm9, %v134_v40 }
 0x12e   :  { %150 = dma.vmem_to_hbm [thread:$0]  %s143_s25, 256, %s145_s28, [#allocation4], %s260_s20, %s260_s20, %s261_s21  }
 0x12f   :  { %257 = dma.done.wait [#allocation4], 256  }
 0x130   :  { %258 = vsyncadd [#allocation4], 4294967040 }
 0x131   :  { %155 = vsyncpa [#allocation3], 1 }
 0x132   :  { %156 = vsyncpa [#allocation6], 1 }
 0x133   :  { %157 = vsyncpa [#allocation4], 1 }

</bundles_post_ra>
